<compile_context>
chip_gen: v6e
topology: v6e:2x2x1
jax: 0.10.0
libtpu: 0.0.40
codegen_flags: <defaults>
</compile_context>

<pallas_src>
import jax
import jax.numpy as jnp
from jax.experimental import pallas as pl
from jax.experimental.pallas import tpu as pltpu


def _round_up(x, m):
    return ((x + m - 1) // m) * m


def _default_lane_align():
    """256 on v6e/v7x (2x256^2 MXU), 128 on v5e and unknown/CPU-interpret."""
    try:
        kind = jax.devices()[0].device_kind.lower()
    except Exception:
        return 128
    return 256 if ("v6" in kind or "v7" in kind) else 128


def _feature_pad(d, lane_align):
    # Always lane-dense (multiple of 128); only go to 256 alignment when the dim
    # is already >128 (padding tiny dims to 256 is pure waste).
    return _round_up(d, 128) if d <= 128 else _round_up(d, lane_align)


# ---------------------------------------------------------------------------
# Kernel
# ---------------------------------------------------------------------------
def decoder_kernel(z_ref, w2_ref, b2_ref, w3_ref, b3_ref, y_ref):
    # fc2: [TB, Zp] @ [Zp, Hp] + [1, Hp]   (MXU, f32 accumulation)
    a = jnp.dot(z_ref[...], w2_ref[...], preferred_element_type=jnp.float32) + b2_ref[...]
    # tanh in f32 (EUP)
    h = jnp.tanh(a)
    # fc3: [TB, Hp] @ [Hp, Op] + [1, Op]   (cast feeds the MXU its native dtype)
    c = jnp.dot(h.astype(w3_ref.dtype), w3_ref[...],
                preferred_element_type=jnp.float32) + b3_ref[...]
    # Exact sigmoid via one EUP op: sigmoid(c) = 0.5 * (tanh(0.5*c) + 1)
    y_ref[...] = (0.5 * (jnp.tanh(0.5 * c) + 1.0)).astype(y_ref.dtype)


# ---------------------------------------------------------------------------
# One-time parameter preparation (pad + cast hoisted out of the hot path)
# ---------------------------------------------------------------------------
def prepare_decoder_params(w2, b2, w3, b3, *, matmul_dtype=jnp.bfloat16, lane_align=None):
    """w2: [Z, H]; b2: [H]/[1,H]; w3: [H, O]; b3: [O]/[1,O] -> padded/cast params."""
    Z, H = w2.shape
    O = w3.shape[1]
    if lane_align is None:
        lane_align = _default_lane_align()
    Zp = _feature_pad(Z, lane_align)
    Hp = _feature_pad(H, lane_align)
    Op = _feature_pad(O, lane_align)

    w2 = jnp.asarray(w2, jnp.float32)
    w3 = jnp.asarray(w3, jnp.float32)
    b2 = jnp.asarray(b2, jnp.float32).reshape(1, H)
    b3 = jnp.asarray(b3, jnp.float32).reshape(1, O)

    # Zero padding is semantics-preserving: padded z cols x zero w2 rows -> 0;
    # tanh(0)=0 through zero w3 rows -> 0; padded output cols are sliced off.
    return dict(
        w2=jnp.pad(w2, ((0, Zp - Z), (0, Hp - H))).astype(matmul_dtype),
        b2=jnp.pad(b2, ((0, 0), (0, Hp - H))),
        w3=jnp.pad(w3, ((0, Hp - H), (0, Op - O))).astype(matmul_dtype),
        b3=jnp.pad(b3, ((0, 0), (0, Op - O))),
        z_dim=Z,
        out_dim=O,
    )


# ---------------------------------------------------------------------------
# Forward
# ---------------------------------------------------------------------------
def decoder_forward(z, params, *, block_batch=512, out_dtype=jnp.float32):
    """z: [B, Z] -> y: [B, O] with params from prepare_decoder_params."""
    w2_p, b2_p, w3_p, b3_p = params["w2"], params["b2"], params["w3"], params["b3"]
    Z, O = params["z_dim"], params["out_dim"]
    Zp, Hp = w2_p.shape
    Op = w3_p.shape[1]
    matmul_dtype = w2_p.dtype
    itemsize = jnp.dtype(matmul_dtype).itemsize
    out_itemsize = jnp.dtype(out_dtype).itemsize

    B = z.shape[0]
    # Sub-32-bit dtypes pack along sublanes: align batch tile to 16 (bf16) / 32 (8-bit).
    row_align = {4: 8, 2: 16, 1: 32}.get(itemsize, 8)
    # Aim for ~4 grid steps so megacore (v7x) and the z/y DMA pipeline actually engage,
    # without over-padding the batch.
    tb_target = _round_up(max(1, -(-B // 4)), row_align)
    TB = max(row_align, min(block_batch, tb_target))
    Bp = _round_up(B, TB)

    # Pad activations only when needed (skip the extra HBM pass when aligned).
    if (Bp, Zp) != (B, Z):
        z_p = jnp.pad(z, ((0, Bp - B), (0, Zp - Z)))
    else:
        z_p = z
    z_p = z_p.astype(matmul_dtype)

    # VMEM budget: double-buffered z/y tiles + single-buffered resident weights.
    vmem_needed = (2 * TB * Zp * itemsize
                   + (Zp * Hp + Hp * Op) * itemsize
                   + (Hp + Op) * 4
                   + 2 * TB * Op * out_itemsize)
    vmem_limit = int(min(64 * 2**20, max(2 * vmem_needed + (1 << 20), 16 * 2**20)))

    cost = pl.CostEstimate(
        flops=2 * Bp * (Zp * Hp + Hp * Op),
        transcendentals=Bp * (Hp + Op),                     # tanh + tanh-form sigmoid
        bytes_accessed=(Bp * Zp + Zp * Hp + Hp * Op) * itemsize
        + (Hp + Op) * 4 + Bp * Op * out_itemsize,
    )

    def _resident(shape):
        # Constant across the grid: single-buffered (halves resident weight VMEM).
        return pl.BlockSpec(shape, lambda i: (0, 0), pipeline_mode=pl.Buffered(1))

    y_p = pl.pallas_call(
        decoder_kernel,
        out_shape=jax.ShapeDtypeStruct((Bp, Op), out_dtype),
        grid=(Bp // TB,),
        in_specs=[
            pl.BlockSpec((TB, Zp), lambda i: (i, 0)),   # streamed batch tile (double-buffered)
            _resident((Zp, Hp)),                        # fc2 weight (resident)
            _resident((1, Hp)),                         # fc2 bias
            _resident((Hp, Op)),                        # fc3 weight (resident)
            _resident((1, Op)),                         # fc3 bias
        ],
        out_specs=pl.BlockSpec((TB, Op), lambda i: (i, 0)),  # lane-dense output tile
        compiler_params=pltpu.CompilerParams(
            dimension_semantics=("parallel",),               # megacore sharding on v7x
            vmem_limit_bytes=vmem_limit,
        ),
        cost_estimate=cost,
    )(z_p, w2_p, b2_p, w3_p, b3_p)

    if (Bp, Op) != (B, O):
        y_p = y_p[:B, :O]
    return y_p


# ---------------------------------------------------------------------------
# Reference + init
# ---------------------------------------------------------------------------
def init_decoder_params(key, input_dim, hidden_dim, z_dim):
    """Deterministic init mimicking nn.Linear's default uniform(-1/sqrt(fan_in), ...)."""
    k1, k2, k3, k4 = jax.random.split(key, 4)
    out_dim = input_dim - 10
    lim2 = 1.0 / jnp.sqrt(z_dim)
    lim3 = 1.0 / jnp.sqrt(hidden_dim)
    w2 = jax.random.uniform(k1, (z_dim, hidden_dim), jnp.float32, -lim2, lim2)
    b2 = jax.random.uniform(k2, (1, hidden_dim), jnp.float32, -lim2, lim2)
    w3 = jax.random.uniform(k3, (hidden_dim, out_dim), jnp.float32, -lim3, lim3)
    b3 = jax.random.uniform(k4, (1, out_dim), jnp.float32, -lim3, lim3)
    return w2, b2, w3, b3


def decoder_reference(z, w2, b2, w3, b3):
    a = z @ w2 + b2
    b = jnp.tanh(a)
    c = b @ w3 + b3
    return jax.nn.sigmoid(c)


if __name__ == "__main__":
    # Small shapes consistent with the module's forward: output dim = input_dim - 10 = 16
    batch, z_dim, hidden_dim, input_dim = 4, 20, 32, 26
    key = jax.random.PRNGKey(0)
    kz, kp = jax.random.split(key)

    z = jax.random.normal(kz, (batch, z_dim), jnp.float32)
    w2, b2, w3, b3 = init_decoder_params(kp, input_dim, hidden_dim, z_dim)
    y_ref = decoder_reference(z, w2, b2, w3, b3)

    # Exact path: f32 matmul operands, exact (tanh-form) sigmoid -> tight tolerance.
    params_f32 = prepare_decoder_params(w2, b2, w3, b3, matmul_dtype=jnp.float32)
    y_f32 = jax.block_until_ready(decoder_forward(z, params_f32))
    assert y_f32.shape == (batch, input_dim - 10)
    assert jnp.allclose(y_f32, y_ref, atol=1e-4, rtol=1e-4), \
        float(jnp.max(jnp.abs(y_f32 - y_ref)))

    # Default fast path: bf16 matmul operands with f32 MXU accumulation.
    params_bf16 = prepare_decoder_params(w2, b2, w3, b3)     # bf16 by default
    y_bf16 = jax.block_until_ready(decoder_forward(z, params_bf16))
    assert y_bf16.shape == (batch, input_dim - 10)
    assert jnp.allclose(y_bf16, y_ref, atol=2e-2, rtol=2e-2), \
        float(jnp.max(jnp.abs(y_bf16 - y_ref)))

    print("KERNEL_OK")
</pallas_src>

<mosaic_0001>
module attributes {stable_mosaic.version = 11 : i64} {
  func.func @decoder_kernel(%arg0: i32, %arg1: memref<8x128xf32, #tpu.memory_space<vmem>>, %arg2: memref<128x128xf32, #tpu.memory_space<vmem>>, %arg3: memref<1x128xf32, #tpu.memory_space<vmem>>, %arg4: memref<128x128xf32, #tpu.memory_space<vmem>>, %arg5: memref<1x128xf32, #tpu.memory_space<vmem>>, %arg6: memref<8x128xf32, #tpu.memory_space<vmem>>) attributes {dimension_semantics = [#tpu.dimension_semantics<parallel>], iteration_bounds = array<i64: 1>, scalar_prefetch = 0 : i64, scratch_operands = 0 : i64, tpu.core_type = #tpu.core_type<tc>, window_params = [{transform_indices = @transform_0, window_bounds = array<i64: 8, 128>}, {pipeline_mode = #tpu.pipeline_mode<synchronous>, transform_indices = @transform_1, window_bounds = array<i64: 128, 128>}, {pipeline_mode = #tpu.pipeline_mode<synchronous>, transform_indices = @transform_2, window_bounds = array<i64: 1, 128>}, {pipeline_mode = #tpu.pipeline_mode<synchronous>, transform_indices = @transform_3, window_bounds = array<i64: 128, 128>}, {pipeline_mode = #tpu.pipeline_mode<synchronous>, transform_indices = @transform_4, window_bounds = array<i64: 1, 128>}, {transform_indices = @transform_5, window_bounds = array<i64: 8, 128>}]} {
    %c0 = arith.constant 0 : index
    %c0_0 = arith.constant 0 : index
    %0 = vector.load %arg1[%c0, %c0_0] : memref<8x128xf32, #tpu.memory_space<vmem>>, vector<8x128xf32>
    %c0_1 = arith.constant 0 : index
    %c0_2 = arith.constant 0 : index
    %1 = vector.load %arg2[%c0_1, %c0_2] : memref<128x128xf32, #tpu.memory_space<vmem>>, vector<128x128xf32>
    %cst = arith.constant dense<0.000000e+00> : vector<8x128xf32>
    %2 = tpu.matmul %0, %1, %cst {dimension_numbers = #tpu.dot_dimension_numbers<[1], [0], [0], [1], [0, 0, 1, 1], [], []>} : vector<8x128xf32>, vector<128x128xf32>, vector<8x128xf32> -> vector<8x128xf32>
    %c0_3 = arith.constant 0 : index
    %c0_4 = arith.constant 0 : index
    %3 = vector.load %arg3[%c0_3, %c0_4] : memref<1x128xf32, #tpu.memory_space<vmem>>, vector<1x128xf32>
    %4 = vector.broadcast %3 : vector<1x128xf32> to vector<8x128xf32>
    %5 = arith.addf %2, %4 : vector<8x128xf32>
    %6 = math.tanh %5 : vector<8x128xf32>
    %c0_5 = arith.constant 0 : index
    %c0_6 = arith.constant 0 : index
    %7 = vector.load %arg4[%c0_5, %c0_6] : memref<128x128xf32, #tpu.memory_space<vmem>>, vector<128x128xf32>
    %cst_7 = arith.constant dense<0.000000e+00> : vector<8x128xf32>
    %8 = tpu.matmul %6, %7, %cst_7 {dimension_numbers = #tpu.dot_dimension_numbers<[1], [0], [0], [1], [0, 0, 1, 1], [], []>} : vector<8x128xf32>, vector<128x128xf32>, vector<8x128xf32> -> vector<8x128xf32>
    %c0_8 = arith.constant 0 : index
    %c0_9 = arith.constant 0 : index
    %9 = vector.load %arg5[%c0_8, %c0_9] : memref<1x128xf32, #tpu.memory_space<vmem>>, vector<1x128xf32>
    %10 = vector.broadcast %9 : vector<1x128xf32> to vector<8x128xf32>
    %11 = arith.addf %8, %10 : vector<8x128xf32>
    %cst_10 = arith.constant 5.000000e-01 : f32
    %12 = vector.broadcast %cst_10 : f32 to vector<8x128xf32>
    %13 = arith.mulf %12, %11 : vector<8x128xf32>
    %14 = math.tanh %13 : vector<8x128xf32>
    %cst_11 = arith.constant 1.000000e+00 : f32
    %15 = vector.broadcast %cst_11 : f32 to vector<8x128xf32>
    %16 = arith.addf %14, %15 : vector<8x128xf32>
    %cst_12 = arith.constant 5.000000e-01 : f32
    %17 = vector.broadcast %cst_12 : f32 to vector<8x128xf32>
    %18 = arith.mulf %17, %16 : vector<8x128xf32>
    %c0_13 = arith.constant 0 : index
    %c0_14 = arith.constant 0 : index
    %19 = vector.load %arg6[%c0_13, %c0_14] : memref<8x128xf32, #tpu.memory_space<vmem>>, vector<8x128xf32>
    tpu.vector_store %arg6[%c0_13, %c0_14], %18 {strides = array<i32>} : memref<8x128xf32, #tpu.memory_space<vmem>>, vector<8x128xf32>,
    return
  }
  func.func @transform_0(%arg0: i32) -> (i32, i32) {
    %c0_i32 = arith.constant 0 : i32
    %c0_i32_0 = arith.constant 0 : i32
    return %arg0, %c0_i32 : i32, i32
  }
  func.func @transform_1(%arg0: i32) -> (i32, i32) {
    %c0_i32 = arith.constant 0 : i32
    %c0_i32_0 = arith.constant 0 : i32
    %c0_i32_1 = arith.constant 0 : i32
    return %c0_i32, %c0_i32_0 : i32, i32
  }
  func.func @transform_2(%arg0: i32) -> (i32, i32) {
    %c0_i32 = arith.constant 0 : i32
    %c0_i32_0 = arith.constant 0 : i32
    %c0_i32_1 = arith.constant 0 : i32
    return %c0_i32, %c0_i32_0 : i32, i32
  }
  func.func @transform_3(%arg0: i32) -> (i32, i32) {
    %c0_i32 = arith.constant 0 : i32
    %c0_i32_0 = arith.constant 0 : i32
    %c0_i32_1 = arith.constant 0 : i32
    return %c0_i32, %c0_i32_0 : i32, i32
  }
  func.func @transform_4(%arg0: i32) -> (i32, i32) {
    %c0_i32 = arith.constant 0 : i32
    %c0_i32_0 = arith.constant 0 : i32
    %c0_i32_1 = arith.constant 0 : i32
    return %c0_i32, %c0_i32_0 : i32, i32
  }
  func.func @transform_5(%arg0: i32) -> (i32, i32) {
    %c0_i32 = arith.constant 0 : i32
    %c0_i32_0 = arith.constant 0 : i32
    return %arg0, %c0_i32 : i32, i32
  }
}

</mosaic_0001>

<bundles_post_ra>
// kernel: tpu_custom_call.1
= control target key start
LH: loop header
LB: loop body
LE: loop exit
PB: predicated region body
PF: predicated region fallthrough
CT: control target
= control target key end

     0   :  { %10 = vsyncpa [#allocation3], 0  ;;  %s563_s0 = inlined_call_operand.hbm [shape: f32[8,128], index: 0, kind: input, shape index: {}]   ;;  %s564_s1 = inlined_call_operand.hbm [shape: f32[128,128], index: 1, kind: input, shape index: {}]   ;;  %s565_s2 = inlined_call_operand.vmem [shape: f32[1,128], index: 2, kind: input, shape index: {}]   ;;  %s566_s3 = inlined_call_operand.hbm [shape: f32[128,128], index: 3, kind: input, shape index: {}]   ;;  %s567_s4 = inlined_call_operand.vmem [shape: f32[1,128], index: 4, kind: input, shape index: {}]   ;;  %s568_s5 = inlined_call_operand.hbm [shape: f32[8,128], index: 5, kind: output, shape index: {}]  }
   0x1   :  { %11 = vsyncpa [#allocation6], 0 }
   0x2   :  { %12 = vsyncpa [#allocation4], 0  ;;  %s473_s18 = smov [#allocation5]  }
   0x3   :  { %s28_s19 = sshll.u32 %s473_s18, 4  ;;  %s29_s19 = int_to_ptr.vmem [resolvable:$true] %s28_s19 }
   0x4   :  { %s395_s20 = scalar_lea.vmem %s29_s19, 2048  ;;  %p400_p1 = scmp.lt.s32.totalorder %s29_s19, %s29_s19 }
   0x5   :  { %p396_p0 = scmp.ne.s32.totalorder %s29_s19, %s395_s20  ;;  %p401_p2 = scmp.lt.s32.totalorder %s395_s20, %s395_s20 }
   0x7   :  { %p402_p3 = por %p401_p2, %p400_p1 }
   0x9   :  { %p403_p4 = pnand %p402_p3, %p396_p0 }
   0xb   :  { %406 = shalt.err (!%p403_p4)
}
   0xc   :  { %s474_s21 = smov 128   ;;  %s475_s22 = smov 8  }
   0xd   :  { %34 = dma.hbm_to_vmem [thread:$0]  %s564_s1, 2048, %s29_s19, [#allocation6], %s474_s21, %s474_s21, %s475_s22  }
   0xe   :  { %s476_s25 = smov [#allocation2]   ;;  %s477_s27 = smov [#allocation7]  }
   0xf   :  { %s19_s26 = sshll.u32 %s476_s25, 4  ;;  %s42_s28 = sshll.u32 %s477_s27, 4  ;;  %s20_s26 = int_to_ptr.vmem [resolvable:$true] %s19_s26  ;;  %s43_s28 = int_to_ptr.vmem [resolvable:$true] %s42_s28 }
  0x10   :  { %s415_s29 = scalar_lea.vmem %s20_s26, 128  ;;  %p420_p6 = scmp.lt.s32.totalorder %s20_s26, %s20_s26 }
  0x11   :  { %p416_p5 = scmp.ne.s32.totalorder %s20_s26, %s415_s29  ;;  %p421_p7 = scmp.lt.s32.totalorder %s415_s29, %s415_s29 }
  0x13   :  { %p422_p8 = por %p421_p7, %p420_p6 }
  0x15   :  { %p423_p9 = pnand %p422_p8, %p416_p5 }
  0x17   :  { %426 = shalt.err (!%p423_p9)
}
  0x18   :  { %22 = dma.hbm_to_vmem [thread:$0]  %s563_s0, 128, %s20_s26, [#allocation3]  }
  0x19   :  { %s435_s7 = scalar_lea.vmem %s43_s28, 2048  ;;  %p440_p11 = scmp.lt.s32.totalorder %s43_s28, %s43_s28 }
  0x1a   :  { %p436_p10 = scmp.ne.s32.totalorder %s43_s28, %s435_s7  ;;  %p441_p12 = scmp.lt.s32.totalorder %s435_s7, %s435_s7 }
  0x1c   :  { %p442_p13 = por %p441_p12, %p440_p11 }
  0x1e   :  { %p443_p0 = pnand %p442_p13, %p436_p10 }
  0x20   :  { %446 = shalt.err (!%p443_p0)
}
  0x21   :  { %48 = dma.hbm_to_vmem [thread:$0]  %s566_s3, 2048, %s43_s28, [#allocation6], %s474_s21, %s474_s21, %s475_s22  }
  0x22   :  { %467 = dma.done.wait [#allocation3], 128  }
  0x23   :  { %468 = vsyncadd [#allocation3], 4294967168 }
  0x24   :  { %469 = dma.done.wait [#allocation6], 4096  }
  0x25   :  { %470 = vsyncadd [#allocation6], 4294963200  ;;  %v478_v0 = vmov 0.0   ;;  %vm479_vm0 = vmmov 0   ;;  %v76_v1 = vld [vmem:[#allocation5 + $0x78] sm:$0xff]  ;;  %v75_v2 = vld [vmem:[#allocation5 + $0x70] sm:$0xff] }
  0x26   :  { %305 = vmatprep.subr.mxu0 %v478_v0  ;;  %337 = vmatprep.mubr.msk.f32.mxu0 %vm479_vm0, %v478_v0  ;;  %v74_v3 = vld [vmem:[#allocation5 + $0x68] sm:$0xff]  ;;  %v73_v4 = vld [vmem:[#allocation5 + $0x60] sm:$0xff]  ;;  %v170_v5 = vld [vmem:[#allocation7 + $0x78] sm:$0xff]  ;;  %s480_s11 = smov [#allocation8]  }
  0x27   :  { %340 = vmatprep.subr.mxu1 %v478_v0  ;;  %372 = vmatprep.mubr.msk.f32.mxu1 %vm479_vm0, %v478_v0  ;;  %v72_v6 = vld [vmem:[#allocation5 + $0x58] sm:$0xff]  ;;  %v169_v7 = vld [vmem:[#allocation7 + $0x70] sm:$0xff]  ;;  %v168_v8 = vld [vmem:[#allocation7 + $0x68] sm:$0xff]  ;;  %s259_s12 = sshll.u32 %s480_s11, 4  ;;  %s260_s12 = int_to_ptr.vmem [resolvable:$true] %s259_s12 }
  0x28   :  { %306 = vmatpush3.msra.mxu0 %v76_v1  ;;  %341 = vmatpush3.msra.mxu1 %v170_v5  ;;  %v71_v9 = vld [vmem:[#allocation5 + $0x50] sm:$0xff]  ;;  %v167_v10 = vld [vmem:[#allocation7 + $0x60] sm:$0xff]  ;;  %v70_v11 = vld [vmem:[#allocation5 + $0x48] sm:$0xff]  ;;  %p452_p2 = scmp.lt.s32.totalorder %s260_s12, %s260_s12 }
  0x29   :  { %307 = vmatprep.subr.mxu0 %v478_v0  ;;  %342 = vmatprep.subr.mxu1 %v478_v0  ;;  %v166_v12 = vld [vmem:[#allocation7 + $0x58] sm:$0xff]  ;;  %v69_v13 = vld [vmem:[#allocation5 + $0x40] sm:$0xff]  ;;  %v165_v14 = vld [vmem:[#allocation7 + $0x50] sm:$0xff] }
  0x2a   :  { %308 = vmatpush3.msra.mxu0 %v75_v2  ;;  %343 = vmatpush3.msra.mxu1 %v169_v7  ;;  %v68_v15 = vld [vmem:[#allocation5 + $0x38] sm:$0xff]  ;;  %v164_v16 = vld [vmem:[#allocation7 + $0x48] sm:$0xff]  ;;  %v67_v17 = vld [vmem:[#allocation5 + $0x30] sm:$0xff] }
  0x2b   :  { %309 = vmatprep.subr.mxu0 %v478_v0  ;;  %344 = vmatprep.subr.mxu1 %v478_v0  ;;  %v66_v18 = vld [vmem:[#allocation5 + $0x28] sm:$0xff]  ;;  %v65_v19 = vld [vmem:[#allocation5 + $0x20] sm:$0xff]  ;;  %v64_v20 = vld [vmem:[#allocation5 + $0x18] sm:$0xff] }
  0x2c   :  { %310 = vmatpush3.msra.mxu0 %v74_v3  ;;  %345 = vmatpush3.msra.mxu1 %v168_v8  ;;  %v63_v21 = vld [vmem:[#allocation5 + $0x10] sm:$0xff]  ;;  %v62_v22 = vld [vmem:[#allocation5 + $0x8] sm:$0xff]  ;;  %v61_v23 = vld [vmem:[#allocation5] sm:$0xff] }
  0x2d   :  { %311 = vmatprep.subr.mxu0 %v478_v0  ;;  %346 = vmatprep.subr.mxu1 %v478_v0  ;;  %v60_v24 = vld [vmem:[#allocation2] sm:$0xff]  ;;  %v163_v25 = vld [vmem:[#allocation7 + $0x40] sm:$0xff]  ;;  %v161_v27 = vld [vmem:[#allocation7 + $0x30] sm:$0xff] }
  0x2e   :  { %312 = vmatpush3.msra.mxu0 %v73_v4  ;;  %347 = vmatpush3.msra.mxu1 %v167_v10  ;;  %v162_v26 = vld [vmem:[#allocation7 + $0x38] sm:$0xff]  ;;  %v160_v28 = vld [vmem:[#allocation7 + $0x28] sm:$0xff]  ;;  %v159_v29 = vld [vmem:[#allocation7 + $0x20] sm:$0xff] }
  0x2f   :  { %313 = vmatprep.subr.mxu0 %v478_v0  ;;  %348 = vmatprep.subr.mxu1 %v478_v0  ;;  %v158_v30 = vld [vmem:[#allocation7 + $0x18] sm:$0xff]  ;;  %v157_v31 = vld [vmem:[#allocation7 + $0x10] sm:$0xff]  ;;  %v156_v32 = vld [vmem:[#allocation7 + $0x8] sm:$0xff] }
  0x30   :  { %314 = vmatpush3.msra.mxu0 %v72_v6  ;;  %349 = vmatpush3.msra.mxu1 %v166_v12  ;;  %v155_v33 = vld [vmem:[#allocation7] sm:$0xff]  ;;  %v269_v34 = vld [vmem:[%s565_s2] ss:$0 sm:$0xff]  ;;  %s447_s2 = scalar_lea.vmem %s260_s12, 128 }
  0x31   :  { %315 = vmatprep.subr.mxu0 %v478_v0  ;;  %350 = vmatprep.subr.mxu1 %v478_v0  ;;  %v270_v39 = vld [vmem:[%s567_s4] ss:$0 sm:$0xff]  ;;  %p448_p1 = scmp.ne.s32.totalorder %s260_s12, %s447_s2  ;;  %p453_p3 = scmp.lt.s32.totalorder %s447_s2, %s447_s2 }
  0x32   :  { %316 = vmatpush3.msra.mxu0 %v71_v9  ;;  %351 = vmatpush3.msra.mxu1 %v165_v14 }
  0x33   :  { %317 = vmatprep.subr.mxu0 %v478_v0  ;;  %352 = vmatprep.subr.mxu1 %v478_v0  ;;  %p454_p4 = por %p453_p3, %p452_p2 }
  0x34   :  { %318 = vmatpush3.msra.mxu0 %v70_v11  ;;  %353 = vmatpush3.msra.mxu1 %v164_v16 }
  0x35   :  { %319 = vmatprep.subr.mxu0 %v478_v0  ;;  %354 = vmatprep.subr.mxu1 %v478_v0  ;;  %p455_p5 = pnand %p454_p4, %p448_p1 }
  0x36   :  { %320 = vmatpush3.msra.mxu0 %v69_v13  ;;  %355 = vmatpush3.msra.mxu1 %v163_v25 }
  0x37   :  { %321 = vmatprep.subr.mxu0 %v478_v0  ;;  %356 = vmatprep.subr.mxu1 %v478_v0 }
  0x38   :  { %322 = vmatpush3.msra.mxu0 %v68_v15  ;;  %357 = vmatpush3.msra.mxu1 %v162_v26 }
  0x39   :  { %323 = vmatprep.subr.mxu0 %v478_v0  ;;  %358 = vmatprep.subr.mxu1 %v478_v0 }
  0x3a   :  { %324 = vmatpush3.msra.mxu0 %v67_v17  ;;  %359 = vmatpush3.msra.mxu1 %v161_v27 }
  0x3b   :  { %325 = vmatprep.subr.mxu0 %v478_v0  ;;  %360 = vmatprep.subr.mxu1 %v478_v0 }
  0x3c   :  { %326 = vmatpush3.msra.mxu0 %v66_v18  ;;  %361 = vmatpush3.msra.mxu1 %v160_v28 }
  0x3d   :  { %327 = vmatprep.subr.mxu0 %v478_v0  ;;  %362 = vmatprep.subr.mxu1 %v478_v0 }
  0x3e   :  { %328 = vmatpush3.msra.mxu0 %v65_v19  ;;  %363 = vmatpush3.msra.mxu1 %v159_v29 }
  0x3f   :  { %329 = vmatprep.subr.mxu0 %v478_v0  ;;  %364 = vmatprep.subr.mxu1 %v478_v0 }
  0x40   :  { %330 = vmatpush3.msra.mxu0 %v64_v20  ;;  %365 = vmatpush3.msra.mxu1 %v158_v30 }
  0x41   :  { %331 = vmatprep.subr.mxu0 %v478_v0  ;;  %366 = vmatprep.subr.mxu1 %v478_v0 }
  0x42   :  { %332 = vmatpush3.msra.mxu0 %v63_v21  ;;  %367 = vmatpush3.msra.mxu1 %v157_v31 }
  0x43   :  { %333 = vmatprep.subr.mxu0 %v478_v0  ;;  %368 = vmatprep.subr.mxu1 %v478_v0 }
  0x44   :  { %334 = vmatpush3.msra.mxu0 %v62_v22  ;;  %369 = vmatpush3.msra.mxu1 %v156_v32 }
  0x45   :  { %335 = vmatprep.subr.mxu0 %v478_v0  ;;  %370 = vmatprep.subr.mxu1 %v478_v0 }
  0x46   :  { %336 = vmatpush3.msra.mxu0 %v61_v23  ;;  %371 = vmatpush3.msra.mxu1 %v155_v33 }
  0x47   :  { %338 = vmatmul.mubr.f32.vlgmr.msra.gmra.mxu0 %v60_v24 }
 0x107   :  { %v150_v35 = vpop.f32.mrf.mxu0 }
 0x108   :  { %v151_v36 = vadd.f32 %v269_v34, %v150_v35 }
 0x109   :  { %v339_v37 = vpop.f32.mrf.mxu0 }
 0x10a   :  { %383 = vtanh.f32 %v151_v36 }
 0x117   :  { %v384_v38 = vpop.eup %383 }
 0x118   :  { %373 = vmatmul.mubr.f32.vlgmr.msra.gmra.mxu1 %v384_v38 }
 0x1d8   :  { %v244_v40 = vpop.f32.mrf.mxu1 }
 0x1d9   :  { %v245_v41 = vadd.f32 %v270_v39, %v244_v40 }
 0x1da   :  { %v374_v42 = vpop.f32.mrf.mxu1 }
 0x1db   :  { %v248_v43 = vmul.f32 0.5, %v245_v41 }
 0x1dd   :  { %385 = vtanh.f32 %v248_v43 }
 0x1ea   :  { %v386_v44 = vpop.eup %385 }
 0x1eb   :  { %v250_v45 = vadd.f32 1.0, %v386_v44 }
 0x1ed   :  { %v251_v46 = vmul.f32 0.5, %v250_v45 }
 0x1ef   :  { %252 = vst [vmem:[#allocation8] sm:$0xff] %v251_v46 }
 0x1f0   :  { %458 = shalt.err (!%p455_p5)
}
 0x1f1   :  { %262 = dma.vmem_to_hbm [thread:$0]  %s260_s12, 128, %s568_s5, [#allocation4]  }
 0x1f2   :  { %471 = dma.done.wait [#allocation4], 128  }
 0x1f3   :  { %472 = vsyncadd [#allocation4], 4294967168 }
 0x1f4   :  { %266 = vsyncpa [#allocation3], 1 }
 0x1f5   :  { %267 = vsyncpa [#allocation6], 1 }
 0x1f6   :  { %268 = vsyncpa [#allocation4], 1 }

</bundles_post_ra>
